<compile_context>
chip_gen: v5e
topology: v5e:2x2
jax: 0.10.0
libtpu: 0.0.40
codegen_flags: <defaults>
</compile_context>

<pallas_src>
import numpy as np
import jax
import jax.numpy as jnp
from jax.experimental import pallas as pl
from jax.experimental.pallas import tpu as pltpu


# ------------------------- fixed (synthetic) dims ---------------------------
B = 2                      # batch
C0, H0, W0 = 4, 16, 16     # input NCHW
KK, STRIDE, PAD = 3, 2, 1  # conv kernel / stride / padding
C1, H1, W1 = 8, 8, 8       # conv1 output
C2, H2, W2 = 16, 4, 4      # conv2 output
FEAT = C2 * H2 * W2        # 256 flattened features (= 2 * 128, lane dense)
ZDIM = 32                  # latent size
NH = 2 * ZDIM              # fused mean||log_var width
LANE = 128                 # TPU lane width = row-band block width
HP0 = H0 + 2 * PAD         # 18 padded rows per batch (conv1 input)
WROW0 = (W0 + 2 * PAD) * C0   # 72 valid columns of a padded conv1-input row
WROW1 = W1 * C1               # 64 valid columns of a conv2-input row
SLAB = 16                  # per-batch row slab in the conv2 input buffer:
                           #   slab rows 0..7  = zeros (row 7 is the top pad row)
                           #   slab rows 8..15 = conv1 output rows 0..7
                           # (bottom pad row is never read for H1=8, stride 2)


# ------------------------------ fused kernel --------------------------------
def _fused_kernel(lhs1_ref, w1_ref, b1_ref, w2_ref, b2_ref, wh_ref, bh_ref,
                  noise_ref, z_ref, h1p_ref, h2_ref):
    f32, bf16 = jnp.float32, jnp.bfloat16

    # ---- conv1: one bf16 MXU matmul on the wrapper-assembled row-band LHS ---
    # w1b / b1b are zero in output columns 64..127, so h1[:, 64:] == 0 after
    # ReLU and the slab copy below is a full 128-lane store.
    h1 = jnp.dot(lhs1_ref[...], w1_ref[...], preferred_element_type=f32)
    h1 = jnp.maximum(h1 + b1_ref[...], 0.0)                    # (B*H1, 128) f32

    # ---- conv2 input: aligned per-batch slabs; all stores are full (8,128) ---
    for b in range(B):
        h1p_ref[b * SLAB:b * SLAB + 8, :] = jnp.zeros((8, LANE), f32)
        h1p_ref[b * SLAB + 8:b * SLAB + 16, :] = h1[b * H1:(b + 1) * H1, :]

    # ---- conv2: row-band LHS assembled as a register value ------------------
    # lhs2[b*H2 + h2, kh*128 + j] = padded_h1_row(b, 2*h2 + kh)[j];
    # padded row p lives at slab row 7 + p.
    rows = []
    for b in range(B):
        taps = [h1p_ref[pl.ds(b * SLAB + 7 + kh, H2, stride=STRIDE), :]
                for kh in range(KK)]
        rows.append(jnp.concatenate(taps, axis=1))             # (H2, 3*128)
    lhs2 = jnp.concatenate(rows, axis=0).astype(bf16)           # (B*H2, 384)
    h2 = jnp.dot(lhs2, w2_ref[...], preferred_element_type=f32)
    h2_ref[...] = jnp.maximum(h2 + b2_ref[...], 0.0)            # (B*H2, 64)

    # ---- dense flatten (b, h2, wo, c2) -> (B, 256); head rows pre-permuted --
    parts = [h2_ref[pl.ds(r, B, stride=H2), :] for r in range(H2)]   # (B,64) each
    lhsh = jnp.concatenate(parts, axis=1).astype(bf16)                # (B, 256)

    # ---- fused mean||log_var head + reparameterization ----------------------
    ml = jnp.dot(lhsh, wh_ref[...], preferred_element_type=f32) + bh_ref[...]
    mean = ml[:, :ZDIM]
    log_var = ml[:, ZDIM:]
    z_ref[...] = mean + jnp.exp(0.5 * log_var) * noise_ref[...]


_VMEM = pl.BlockSpec(memory_space=pltpu.MemorySpace.VMEM)

_fused_call = pl.pallas_call(
    _fused_kernel,
    out_shape=jax.ShapeDtypeStruct((B, ZDIM), jnp.float32),
    in_specs=[_VMEM] * 8,
    out_specs=_VMEM,
    scratch_shapes=[
        pltpu.VMEM((B * SLAB, LANE), jnp.float32),     # h1p (32, 128)
        pltpu.VMEM((B * H2, W2 * C2), jnp.float32),    # h2  ( 8,  64)
    ],
)


# ------------------------------- JAX wrapper ---------------------------------
@jax.jit
def v_model_forward(x_nchw, packed, noise):
    """z = V_Model.forward(x); reparameterization noise passed in explicitly."""
    x = jnp.transpose(x_nchw, (0, 2, 3, 1)).astype(jnp.float32)      # NHWC
    xp = jnp.pad(x, ((0, 0), (PAD, PAD), (PAD, PAD), (0, 0)))        # (B,18,18,C0)
    x2d = xp.reshape(B, HP0, WROW0)                                  # (B,18,72)
    x2d = jnp.pad(x2d, ((0, 0), (0, 0), (0, LANE - WROW0)))          # (B,18,128)
    # conv1 row-band LHS built here (same fusion), not in the kernel:
    # lhs1[b*H1 + h, kh*128 + j] = x2d[b, 2*h + kh, j]
    bands = jnp.stack([x2d[:, kh:kh + STRIDE * H1:STRIDE, :] for kh in range(KK)],
                      axis=2)                                        # (B,H1,KK,128)
    lhs1 = bands.reshape(B * H1, KK * LANE).astype(jnp.bfloat16)     # (16, 384)
    return _fused_call(lhs1, packed["w1b"], packed["b1b"],
                       packed["w2b"], packed["b2b"],
                       packed["whb"], packed["bhb"], noise)


# --------------------------- offline weight packing --------------------------
def _pack_rowband_conv_weight(w_oihw, w_out, cin_cols, out_cols, *, shift):
    """Pack a torch OIHW conv weight into the row-band matmul weight (bf16).

    LHS block kh has LANE columns; column (wp*cin + ci) holds the input pixel
    at stored width-position wp.  Output column (wo*cout + co).  Tap (wo, kw)
    reads stored position stride*wo + kw + shift; taps landing outside the
    stored data hit ZERO padding and are simply dropped (valid only because
    the padding is zero).  Columns >= w_out*cout stay zero (lane padding).
    """
    cout, cin, kh_, kw_ = w_oihw.shape
    w_np = np.asarray(w_oihw, np.float32)
    out = np.zeros((kh_ * LANE, out_cols), np.float32)
    n_wpos = cin_cols // cin
    for kh in range(kh_):
        for kw in range(kw_):
            for wo in range(w_out):
                wp = STRIDE * wo + kw + shift
                if wp < 0 or wp >= n_wpos:
                    continue
                r0 = kh * LANE + wp * cin
                out[r0:r0 + cin, wo * cout:(wo + 1) * cout] = w_np[:, :, kh, kw].T
    return jnp.asarray(out, jnp.bfloat16)


def _pack_head_weight(wm_t, wv_t):
    """Fuse mean/log_var Linear weights ((out,in) torch layout), permute rows
    from PyTorch NCHW-flatten order to the kernel's dense (h2, wo, c2) order."""
    wf = np.concatenate([np.asarray(wm_t, np.float32).T,
                         np.asarray(wv_t, np.float32).T], axis=1)    # (FEAT, NH)
    out = np.zeros((FEAT, NH), np.float32)
    for h2r in range(H2):
        for wo in range(W2):
            for c2 in range(C2):
                p = h2r * (W2 * C2) + wo * C2 + c2     # kernel dense column
                q = c2 * (H2 * W2) + h2r * W2 + wo     # torch flatten index
                out[p] = wf[q]
    return jnp.asarray(out, jnp.bfloat16)


def pack_params(raw):
    b1b = np.zeros((1, LANE), np.float32)
    b1b[0, :W1 * C1] = np.tile(np.asarray(raw["b1"], np.float32), W1)
    return {
        "w1b": _pack_rowband_conv_weight(raw["w1"], W1, WROW0, LANE, shift=0),
        "b1b": jnp.asarray(b1b),                                        # (1, 128)
        "w2b": _pack_rowband_conv_weight(raw["w2"], W2, WROW1, W2 * C2, shift=-1),
        "b2b": jnp.tile(raw["b2"].reshape(1, C2), (1, W2)),             # (1, 64)
        "whb": _pack_head_weight(raw["wm"], raw["wv"]),                 # (256, 64)
        "bhb": jnp.concatenate([raw["bm"], raw["bv"]]).reshape(1, NH),  # (1, 64)
    }


def init_params(key):
    ks = jax.random.split(key, 8)
    ws, bs = 0.05, 0.1
    raw = {
        "w1": ws * jax.random.normal(ks[0], (C1, C0, KK, KK), jnp.float32),  # OIHW
        "b1": bs * jax.random.normal(ks[1], (C1,), jnp.float32),
        "w2": ws * jax.random.normal(ks[2], (C2, C1, KK, KK), jnp.float32),
        "b2": bs * jax.random.normal(ks[3], (C2,), jnp.float32),
        "wm": ws * jax.random.normal(ks[4], (ZDIM, FEAT), jnp.float32),      # (out,in)
        "bm": bs * jax.random.normal(ks[5], (ZDIM,), jnp.float32),
        "wv": ws * jax.random.normal(ks[6], (ZDIM, FEAT), jnp.float32),
        "bv": bs * jax.random.normal(ks[7], (ZDIM,), jnp.float32),
    }
    return raw, pack_params(raw)


# ------------------------- pure-JAX reference (check) ------------------------
def v_model_reference(x_nchw, raw, noise):
    hp = jax.lax.Precision.HIGHEST
    h = jax.lax.conv_general_dilated(
        x_nchw, raw["w1"], (STRIDE, STRIDE), ((PAD, PAD), (PAD, PAD)),
        dimension_numbers=("NCHW", "OIHW", "NCHW"), precision=hp)
    h = jnp.maximum(h + raw["b1"].reshape(1, -1, 1, 1), 0.0)
    h = jax.lax.conv_general_dilated(
        h, raw["w2"], (STRIDE, STRIDE), ((PAD, PAD), (PAD, PAD)),
        dimension_numbers=("NCHW", "OIHW", "NCHW"), precision=hp)
    h = jnp.maximum(h + raw["b2"].reshape(1, -1, 1, 1), 0.0)
    h = h.reshape(h.shape[0], -1)                        # PyTorch NCHW flatten
    mean = jnp.matmul(h, raw["wm"].T, precision=hp) + raw["bm"]
    log_var = jnp.matmul(h, raw["wv"].T, precision=hp) + raw["bv"]
    return mean + jnp.exp(0.5 * log_var) * noise


# ----------------------------------- main ------------------------------------
if __name__ == "__main__":
    key = jax.random.PRNGKey(0)
    k_x, k_p, k_n = jax.random.split(key, 3)

    x = jax.random.normal(k_x, (B, C0, H0, W0), jnp.float32)   # NCHW like PyTorch
    raw, packed = init_params(k_p)
    noise = jax.random.normal(k_n, (B, ZDIM), jnp.float32)     # torch.normal(0, 1, ...)

    z = v_model_forward(x, packed, noise)
    jax.block_until_ready(z)
    assert z.shape == (B, ZDIM) and z.dtype == jnp.float32

    z_ref = v_model_reference(x, raw, noise)
    err = float(jnp.max(jnp.abs(z - z_ref)))
    # Tolerance deliberately covers the bf16 MXU-operand path (observed error
    # ~5e-3); a packing/permutation regression would be O(0.1) and still fail.
    assert err < 2e-2, f"kernel mismatch vs reference: max abs err = {err}"

    print("KERNEL_OK")
</pallas_src>

<mosaic_0001>
module attributes {stable_mosaic.version = 11 : i64} {
  func.func @_fused_kernel(%arg0: memref<16x384xbf16, #tpu.memory_space<vmem>>, %arg1: memref<384x128xbf16, #tpu.memory_space<vmem>>, %arg2: memref<1x128xf32, #tpu.memory_space<vmem>>, %arg3: memref<384x64xbf16, #tpu.memory_space<vmem>>, %arg4: memref<1x64xf32, #tpu.memory_space<vmem>>, %arg5: memref<256x64xbf16, #tpu.memory_space<vmem>>, %arg6: memref<1x64xf32, #tpu.memory_space<vmem>>, %arg7: memref<2x32xf32, #tpu.memory_space<vmem>>, %arg8: memref<2x32xf32, #tpu.memory_space<vmem>>, %arg9: memref<32x128xf32, #tpu.memory_space<vmem>>, %arg10: memref<8x64xf32, #tpu.memory_space<vmem>>) attributes {dimension_semantics = [], scalar_prefetch = 0 : i64, scratch_operands = 2 : i64, tpu.core_type = #tpu.core_type<tc>} {
    %c0 = arith.constant 0 : index
    %c0_0 = arith.constant 0 : index
    %0 = vector.load %arg0[%c0, %c0_0] : memref<16x384xbf16, #tpu.memory_space<vmem>>, vector<16x384xbf16>
    %c0_1 = arith.constant 0 : index
    %c0_2 = arith.constant 0 : index
    %1 = vector.load %arg1[%c0_1, %c0_2] : memref<384x128xbf16, #tpu.memory_space<vmem>>, vector<384x128xbf16>
    %cst = arith.constant dense<0.000000e+00> : vector<16x128xf32>
    %2 = tpu.matmul %0, %1, %cst {dimension_numbers = #tpu.dot_dimension_numbers<[1], [0], [0], [1], [0, 0, 1, 1], [], []>} : vector<16x384xbf16>, vector<384x128xbf16>, vector<16x128xf32> -> vector<16x128xf32>
    %c0_3 = arith.constant 0 : index
    %c0_4 = arith.constant 0 : index
    %3 = vector.load %arg2[%c0_3, %c0_4] : memref<1x128xf32, #tpu.memory_space<vmem>>, vector<1x128xf32>
    %4 = vector.broadcast %3 : vector<1x128xf32> to vector<16x128xf32>
    %5 = arith.addf %2, %4 : vector<16x128xf32>
    %cst_5 = arith.constant 0.000000e+00 : f32
    %6 = vector.broadcast %cst_5 : f32 to vector<16x128xf32>
    %7 = arith.maximumf %5, %6 : vector<16x128xf32>
    %cst_6 = arith.constant 0.000000e+00 : f32
    %8 = vector.broadcast %cst_6 : f32 to vector<8x128xf32>
    %c0_7 = arith.constant 0 : index
    %c0_8 = arith.constant 0 : index
    %9 = vector.load %arg9[%c0_7, %c0_8] : memref<32x128xf32, #tpu.memory_space<vmem>>, vector<8x128xf32>
    tpu.vector_store %arg9[%c0_7, %c0_8], %8 {strides = array<i32>} : memref<32x128xf32, #tpu.memory_space<vmem>>, vector<8x128xf32>,
    %10 = vector.extract_strided_slice %7 {offsets = [0, 0], sizes = [8, 128], strides = [1, 1]} : vector<16x128xf32> to vector<8x128xf32>
    %c8 = arith.constant 8 : index
    %c0_9 = arith.constant 0 : index
    %11 = vector.load %arg9[%c8, %c0_9] : memref<32x128xf32, #tpu.memory_space<vmem>>, vector<8x128xf32>
    tpu.vector_store %arg9[%c8, %c0_9], %10 {strides = array<i32>} : memref<32x128xf32, #tpu.memory_space<vmem>>, vector<8x128xf32>,
    %cst_10 = arith.constant 0.000000e+00 : f32
    %12 = vector.broadcast %cst_10 : f32 to vector<8x128xf32>
    %c16 = arith.constant 16 : index
    %c0_11 = arith.constant 0 : index
    %13 = vector.load %arg9[%c16, %c0_11] : memref<32x128xf32, #tpu.memory_space<vmem>>, vector<8x128xf32>
    tpu.vector_store %arg9[%c16, %c0_11], %12 {strides = array<i32>} : memref<32x128xf32, #tpu.memory_space<vmem>>, vector<8x128xf32>,
    %14 = vector.extract_strided_slice %7 {offsets = [8, 0], sizes = [8, 128], strides = [1, 1]} : vector<16x128xf32> to vector<8x128xf32>
    %c24 = arith.constant 24 : index
    %c0_12 = arith.constant 0 : index
    %15 = vector.load %arg9[%c24, %c0_12] : memref<32x128xf32, #tpu.memory_space<vmem>>, vector<8x128xf32>
    tpu.vector_store %arg9[%c24, %c0_12], %14 {strides = array<i32>} : memref<32x128xf32, #tpu.memory_space<vmem>>, vector<8x128xf32>,
    %c7 = arith.constant 7 : index
    %c0_13 = arith.constant 0 : index
    %16 = tpu.strided_load %arg9[%c7, %c0_13] {strides = array<i32: 2, 1>} : memref<32x128xf32, #tpu.memory_space<vmem>>, vector<4x128xf32>
    %c8_14 = arith.constant 8 : index
    %c0_15 = arith.constant 0 : index
    %17 = tpu.strided_load %arg9[%c8_14, %c0_15] {strides = array<i32: 2, 1>} : memref<32x128xf32, #tpu.memory_space<vmem>>, vector<4x128xf32>
    %c9 = arith.constant 9 : index
    %c0_16 = arith.constant 0 : index
    %18 = tpu.strided_load %arg9[%c9, %c0_16] {strides = array<i32: 2, 1>} : memref<32x128xf32, #tpu.memory_space<vmem>>, vector<4x128xf32>
    %19 = tpu.concatenate %16, %17, %18 in 1 : vector<4x128xf32>, vector<4x128xf32>, vector<4x128xf32> -> vector<4x384xf32>
    %c23 = arith.constant 23 : index
    %c0_17 = arith.constant 0 : index
    %20 = tpu.strided_load %arg9[%c23, %c0_17] {strides = array<i32: 2, 1>} : memref<32x128xf32, #tpu.memory_space<vmem>>, vector<4x128xf32>
    %c24_18 = arith.constant 24 : index
    %c0_19 = arith.constant 0 : index
    %21 = tpu.strided_load %arg9[%c24_18, %c0_19] {strides = array<i32: 2, 1>} : memref<32x128xf32, #tpu.memory_space<vmem>>, vector<4x128xf32>
    %c25 = arith.constant 25 : index
    %c0_20 = arith.constant 0 : index
    %22 = tpu.strided_load %arg9[%c25, %c0_20] {strides = array<i32: 2, 1>} : memref<32x128xf32, #tpu.memory_space<vmem>>, vector<4x128xf32>
    %23 = tpu.concatenate %20, %21, %22 in 1 : vector<4x128xf32>, vector<4x128xf32>, vector<4x128xf32> -> vector<4x384xf32>
    %24 = tpu.concatenate %19, %23 in 0 : vector<4x384xf32>, vector<4x384xf32> -> vector<8x384xf32>
    %25 = arith.truncf %24 : vector<8x384xf32> to vector<8x384xbf16>
    %c0_21 = arith.constant 0 : index
    %c0_22 = arith.constant 0 : index
    %26 = vector.load %arg3[%c0_21, %c0_22] : memref<384x64xbf16, #tpu.memory_space<vmem>>, vector<384x64xbf16>
    %cst_23 = arith.constant dense<0.000000e+00> : vector<8x64xf32>
    %27 = tpu.matmul %25, %26, %cst_23 {dimension_numbers = #tpu.dot_dimension_numbers<[1], [0], [0], [1], [0, 0, 1, 1], [], []>} : vector<8x384xbf16>, vector<384x64xbf16>, vector<8x64xf32> -> vector<8x64xf32>
    %c0_24 = arith.constant 0 : index
    %c0_25 = arith.constant 0 : index
    %28 = vector.load %arg4[%c0_24, %c0_25] : memref<1x64xf32, #tpu.memory_space<vmem>>, vector<1x64xf32>
    %29 = vector.broadcast %28 : vector<1x64xf32> to vector<8x64xf32>
    %30 = arith.addf %27, %29 : vector<8x64xf32>
    %cst_26 = arith.constant 0.000000e+00 : f32
    %31 = vector.broadcast %cst_26 : f32 to vector<8x64xf32>
    %32 = arith.maximumf %30, %31 : vector<8x64xf32>
    %c0_27 = arith.constant 0 : index
    %c0_28 = arith.constant 0 : index
    %33 = vector.load %arg10[%c0_27, %c0_28] : memref<8x64xf32, #tpu.memory_space<vmem>>, vector<8x64xf32>
    tpu.vector_store %arg10[%c0_27, %c0_28], %32 {strides = array<i32>} : memref<8x64xf32, #tpu.memory_space<vmem>>, vector<8x64xf32>,
    %c0_29 = arith.constant 0 : index
    %c0_30 = arith.constant 0 : index
    %34 = tpu.strided_load %arg10[%c0_29, %c0_30] {strides = array<i32: 4, 1>} : memref<8x64xf32, #tpu.memory_space<vmem>>, vector<2x64xf32>
    %c1 = arith.constant 1 : index
    %c0_31 = arith.constant 0 : index
    %35 = tpu.strided_load %arg10[%c1, %c0_31] {strides = array<i32: 4, 1>} : memref<8x64xf32, #tpu.memory_space<vmem>>, vector<2x64xf32>
    %c2 = arith.constant 2 : index
    %c0_32 = arith.constant 0 : index
    %36 = tpu.strided_load %arg10[%c2, %c0_32] {strides = array<i32: 4, 1>} : memref<8x64xf32, #tpu.memory_space<vmem>>, vector<2x64xf32>
    %c3 = arith.constant 3 : index
    %c0_33 = arith.constant 0 : index
    %37 = tpu.strided_load %arg10[%c3, %c0_33] {strides = array<i32: 4, 1>} : memref<8x64xf32, #tpu.memory_space<vmem>>, vector<2x64xf32>
    %38 = tpu.concatenate %34, %35, %36, %37 in 1 : vector<2x64xf32>, vector<2x64xf32>, vector<2x64xf32>, vector<2x64xf32> -> vector<2x256xf32>
    %39 = arith.truncf %38 : vector<2x256xf32> to vector<2x256xbf16>
    %c0_34 = arith.constant 0 : index
    %c0_35 = arith.constant 0 : index
    %40 = vector.load %arg5[%c0_34, %c0_35] : memref<256x64xbf16, #tpu.memory_space<vmem>>, vector<256x64xbf16>
    %cst_36 = arith.constant dense<0.000000e+00> : vector<2x64xf32>
    %41 = tpu.matmul %39, %40, %cst_36 {dimension_numbers = #tpu.dot_dimension_numbers<[1], [0], [0], [1], [0, 0, 1, 1], [], []>} : vector<2x256xbf16>, vector<256x64xbf16>, vector<2x64xf32> -> vector<2x64xf32>
    %c0_37 = arith.constant 0 : index
    %c0_38 = arith.constant 0 : index
    %42 = vector.load %arg6[%c0_37, %c0_38] : memref<1x64xf32, #tpu.memory_space<vmem>>, vector<1x64xf32>
    %43 = vector.broadcast %42 : vector<1x64xf32> to vector<2x64xf32>
    %44 = arith.addf %41, %43 : vector<2x64xf32>
    %45 = vector.extract_strided_slice %44 {offsets = [0, 0], sizes = [2, 32], strides = [1, 1]} : vector<2x64xf32> to vector<2x32xf32>
    %46 = vector.extract_strided_slice %44 {offsets = [0, 32], sizes = [2, 32], strides = [1, 1]} : vector<2x64xf32> to vector<2x32xf32>
    %cst_39 = arith.constant 5.000000e-01 : f32
    %47 = vector.broadcast %cst_39 : f32 to vector<2x32xf32>
    %48 = arith.mulf %47, %46 : vector<2x32xf32>
    %49 = math.exp %48 : vector<2x32xf32>
    %c0_40 = arith.constant 0 : index
    %c0_41 = arith.constant 0 : index
    %50 = vector.load %arg7[%c0_40, %c0_41] : memref<2x32xf32, #tpu.memory_space<vmem>>, vector<2x32xf32>
    %51 = arith.mulf %49, %50 : vector<2x32xf32>
    %52 = arith.addf %45, %51 : vector<2x32xf32>
    %c0_42 = arith.constant 0 : index
    %c0_43 = arith.constant 0 : index
    %53 = vector.load %arg8[%c0_42, %c0_43] : memref<2x32xf32, #tpu.memory_space<vmem>>, vector<2x32xf32>
    tpu.vector_store %arg8[%c0_42, %c0_43], %52 {strides = array<i32>} : memref<2x32xf32, #tpu.memory_space<vmem>>, vector<2x32xf32>,
    return
  }
}

</mosaic_0001>

<bundles_post_ra>
// kernel: v_model_forward.1
= control target key start
LH: loop header
LB: loop body
LE: loop exit
PB: predicated region body
PF: predicated region fallthrough
CT: control target
= control target key end

     0   :  { %s1423_s0 = inlined_call_operand.vmem [shape: bf16[16,384], index: 0, kind: input, shape index: {}]   ;;  %s1424_s1 = inlined_call_operand.vmem [shape: bf16[384,128], index: 1, kind: input, shape index: {}]   ;;  %s1425_s2 = inlined_call_operand.vmem [shape: f32[1,128], index: 2, kind: input, shape index: {}]   ;;  %s1426_s3 = inlined_call_operand.vmem [shape: bf16[384,64], index: 3, kind: input, shape index: {}]   ;;  %s1427_s4 = inlined_call_operand.vmem [shape: f32[1,64], index: 4, kind: input, shape index: {}]   ;;  %s1428_s5 = inlined_call_operand.vmem [shape: bf16[256,64], index: 5, kind: input, shape index: {}]   ;;  %s1429_s6 = inlined_call_operand.vmem [shape: f32[1,64], index: 6, kind: input, shape index: {}]   ;;  %s1430_s7 = inlined_call_operand.vmem [shape: f32[2,32], index: 7, kind: input, shape index: {}]   ;;  %s1431_s8 = inlined_call_operand.hbm [shape: f32[2,32], index: 8, kind: output, shape index: {}]  }
   0x1   :  { %v1047_v0 = vld [vmem:[%s1424_s1 + $0x38] sm:$0xff]  ;;  %v1046_v3 = vld [vmem:[%s1424_s1 + $0x30] sm:$0xff]  ;;  %v1045_v6 = vld [vmem:[%s1424_s1 + $0x28] sm:$0xff] }
   0x2   :  { %v1055_v1 = vld [vmem:[%s1424_s1 + $0x78] sm:$0xff]  ;;  %246 = vmatpush.bf16.msra.mxu0 %v1047_v0  ;;  %v1054_v4 = vld [vmem:[%s1424_s1 + $0x70] sm:$0xff]  ;;  %v1053_v7 = vld [vmem:[%s1424_s1 + $0x68] sm:$0xff] }
   0x3   :  { %v1063_v2 = vld [vmem:[%s1424_s1 + $0xb8] sm:$0xff]  ;;  %260 = vmatpush.bf16.msra.mxu1 %v1055_v1  ;;  %v1062_v5 = vld [vmem:[%s1424_s1 + $0xb0] sm:$0xff]  ;;  %v1061_v8 = vld [vmem:[%s1424_s1 + $0xa8] sm:$0xff] }
   0x4   :  { %274 = vmatpush.bf16.msra.mxu2 %v1063_v2  ;;  %v1044_v9 = vld [vmem:[%s1424_s1 + $0x20] sm:$0xff] }
   0x5   :  { %v1052_v10 = vld [vmem:[%s1424_s1 + $0x60] sm:$0xff] }
   0x6   :  { %247 = vmatpush.bf16.msra.mxu0 %v1046_v3  ;;  %v1060_v11 = vld [vmem:[%s1424_s1 + $0xa0] sm:$0xff] }
   0x7   :  { %261 = vmatpush.bf16.msra.mxu1 %v1054_v4 }
   0x8   :  { %275 = vmatpush.bf16.msra.mxu2 %v1062_v5 }
   0xa   :  { %248 = vmatpush.bf16.msra.mxu0 %v1045_v6 }
   0xb   :  { %262 = vmatpush.bf16.msra.mxu1 %v1053_v7 }
   0xc   :  { %276 = vmatpush.bf16.msra.mxu2 %v1061_v8 }
   0xd   :  { %13 = vsyncpa [#allocation5], 0  ;;  %v1043_v12 = vld [vmem:[%s1424_s1 + $0x18] sm:$0xff]  ;;  %v1042_v15 = vld [vmem:[%s1424_s1 + $0x10] sm:$0xff]  ;;  %v1145_v45 = vmov 0.0   ;;  %vm315_vm0 = vcmask 1043456  }
   0xe   :  { %249 = vmatpush.bf16.msra.mxu0 %v1044_v9  ;;  %v1051_v13 = vld [vmem:[%s1424_s1 + $0x58] sm:$0xff]  ;;  %v1050_v16 = vld [vmem:[%s1424_s1 + $0x50] sm:$0xff]  ;;  %v1041_v18 = vld [vmem:[%s1424_s1 + $0x8] sm:$0xff]  ;;  %290 = vst [vmem:[#allocation2] sm:$0xff] %v1145_v45  ;;  %vm558_vm1 = vcmask 523264   ;;  %s1146_s23 = smov 64  }
   0xf   :  { %263 = vmatpush.bf16.msra.mxu1 %v1052_v10  ;;  %v1059_v14 = vld [vmem:[%s1424_s1 + $0x98] sm:$0xff]  ;;  %v1058_v17 = vld [vmem:[%s1424_s1 + $0x90] sm:$0xff]  ;;  %v1049_v19 = vld [vmem:[%s1424_s1 + $0x48] sm:$0xff]  ;;  %292 = vst [vmem:[#allocation2 + $0x10] sm:$0xff] %v1145_v45  ;;  %s1147_s29 = smov 32   ;;  %s1149_s9 = smov [#allocation4]  }
  0x10   :  { %277 = vmatpush.bf16.msra.mxu2 %v1060_v11  ;;  %v1057_v20 = vld [vmem:[%s1424_s1 + $0x88] sm:$0xff]  ;;  %v1040_v21 = vld [vmem:[%s1424_s1] sm:$0xff]  ;;  %v773_v26 = vld [vmem:[%s1423_s0 + $0xc] sm:$0xf0]  ;;  %s758_s10 = sshll.u32 %s1149_s9, 4  ;;  %vm751_vm2 = vcmask 254976   ;;  %s759_s10 = int_to_ptr.vmem [resolvable:$true] %s758_s10 }
  0x11   :  { %v1048_v22 = vld [vmem:[%s1424_s1 + $0x40] sm:$0xff]  ;;  %v1038_v24 = vld [vmem:[%s1423_s0 + $0x8] sm:$0xf0]  ;;  %v779_v28 = vld [vmem:[%s1423_s0 + $0x8] sm:$0xf] }
  0x12   :  { %250 = vmatpush.bf16.msra.mxu0 %v1043_v12  ;;  %v771_v23 = vld [vmem:[%s1423_s0] sm:$0xf]  ;;  %v1037_v25 = vld [vmem:[%s1423_s0 + $0x4] sm:$0xf]  ;;  %v1039_v29 = vld [vmem:[%s1423_s0 + $0x10] sm:$0xf0] }
  0x13   :  { %264 = vmatpush.bf16.msra.mxu1 %v1051_v13  ;;  %v1056_v27 = vld [vmem:[%s1424_s1 + $0x80] sm:$0xff]  ;;  %v772_v30 = vor.u32 %v1038_v24, %v771_v23  ;;  %v776_v31 = vor.u32 %v1037_v25, %v773_v26  ;;  %v780_v32 = vor.u32 %v1039_v29, %v779_v28  ;;  %v1071_v33 = vld [vmem:[%s1426_s3 + $0x38] sm:$0xff]  ;;  %v1070_v36 = vld [vmem:[%s1426_s3 + $0x30] sm:$0xff] }
  0x14   :  { %278 = vmatpush.bf16.msra.mxu2 %v1059_v14  ;;  %v1079_v34 = vld [vmem:[%s1426_s3 + $0x78] sm:$0xff]  ;;  %518 = vmatpush.bf16.msra.mxu3 %v1071_v33  ;;  %v1078_v37 = vld [vmem:[%s1426_s3 + $0x70] sm:$0xff]  ;;  %v1069_v39 = vld [vmem:[%s1426_s3 + $0x28] sm:$0xff] }
  0x15   :  { %v1087_v35 = vld [vmem:[%s1426_s3 + $0xb8] sm:$0xff]  ;;  %v1086_v38 = vld [vmem:[%s1426_s3 + $0xb0] sm:$0xff]  ;;  %v1077_v40 = vld [vmem:[%s1426_s3 + $0x68] sm:$0xff] }
  0x16   :  { %251 = vmatpush.bf16.msra.mxu0 %v1042_v15  ;;  %v1085_v41 = vld [vmem:[%s1426_s3 + $0xa8] sm:$0xff]  ;;  %v1068_v42 = vld [vmem:[%s1426_s3 + $0x20] sm:$0xff]  ;;  %v1067_v46 = vld [vmem:[%s1426_s3 + $0x18] sm:$0xff] }
  0x17   :  { %265 = vmatpush.bf16.msra.mxu1 %v1050_v16  ;;  %v1076_v43 = vld [vmem:[%s1426_s3 + $0x60] sm:$0xff]  ;;  %v1075_v47 = vld [vmem:[%s1426_s3 + $0x58] sm:$0xff]  ;;  %v1066_v49 = vld [vmem:[%s1426_s3 + $0x10] sm:$0xff] }
  0x18   :  { %279 = vmatpush.bf16.msra.mxu2 %v1058_v17  ;;  %519 = vmatpush.bf16.msra.mxu3 %v1070_v36  ;;  %v1084_v44 = vld [vmem:[%s1426_s3 + $0xa0] sm:$0xff]  ;;  %v1083_v48 = vld [vmem:[%s1426_s3 + $0x98] sm:$0xff]  ;;  %v1074_v50 = vld [vmem:[%s1426_s3 + $0x50] sm:$0xff] }
  0x19   :  { %v1082_v51 = vld [vmem:[%s1426_s3 + $0x90] sm:$0xff]  ;;  %v1065_v52 = vld [vmem:[%s1426_s3 + $0x8] sm:$0xff]  ;;  %v1064_v55 = vld [vmem:[%s1426_s3] sm:$0xff] }
  0x1a   :  { %252 = vmatpush.bf16.msra.mxu0 %v1041_v18  ;;  %v1073_v53 = vld [vmem:[%s1426_s3 + $0x48] sm:$0xff]  ;;  %v1072_v56 = vld [vmem:[%s1426_s3 + $0x40] sm:$0xff]  ;;  %v1095_v24 = vld [vmem:[%s1428_s5 + $0x38] sm:$0xff] }
  0x1b   :  { %266 = vmatpush.bf16.msra.mxu1 %v1049_v19  ;;  %v1081_v54 = vld [vmem:[%s1426_s3 + $0x88] sm:$0xff]  ;;  %v1080_v57 = vld [vmem:[%s1426_s3 + $0x80] sm:$0xff]  ;;  %v1103_v25 = vld [vmem:[%s1428_s5 + $0x78] sm:$0xff] }
  0x1c   :  { %280 = vmatpush.bf16.msra.mxu2 %v1057_v20  ;;  %520 = vmatpush.bf16.msra.mxu3 %v1069_v39  ;;  %v1114_v58 = vld [vmem:[%s1425_s2] ss:$0 sm:$0xff]  ;;  %v1094_v26 = vld [vmem:[%s1428_s5 + $0x30] sm:$0xff]  ;;  %v1093_v28 = vld [vmem:[%s1428_s5 + $0x28] sm:$0xff] }
  0x1d   :  { %v1101_v29 = vld [vmem:[%s1428_s5 + $0x68] sm:$0xff]  ;;  %v1092_v33 = vld [vmem:[%s1428_s5 + $0x20] sm:$0xff] }
  0x1e   :  { %253 = vmatpush.bf16.msra.mxu0 %v1040_v21 }
  0x1f   :  { %267 = vmatpush.bf16.msra.mxu1 %v1048_v22 }
  0x20   :  { %281 = vmatpush.bf16.msra.mxu2 %v1056_v27  ;;  %521 = vmatpush.bf16.msra.mxu3 %v1068_v42  ;;  %v1102_v27 = vld [vmem:[%s1428_s5 + $0x70] sm:$0xff] }
  0x21   :  { %254 = vmatmul.bf16.vlgmr.msra.gmra.mxu0 %v772_v30 }
  0x22   :  { %268 = vmatmul.bf16.vlgmr.msra.gmra.mxu1 %v776_v31  ;;  %531 = vmatpush.bf16.msrb.mxu0 %v1079_v34  ;;  %v1100_v34 = vld [vmem:[%s1428_s5 + $0x60] sm:$0xff] }
  0x23   :  { %282 = vmatmul.bf16.vlgmr.msra.gmra.mxu2 %v780_v32  ;;  %544 = vmatpush.bf16.msrb.mxu1 %v1087_v35  ;;  %v1115_v32 = vld [vmem:[%s1427_s4] ss:$0 sm:$0xff] }
  0x24   :  { %522 = vmatpush.bf16.msra.mxu3 %v1067_v46  ;;  %711 = vmatpush.bf16.msrb.mxu2 %v1095_v24 }
  0x26   :  { %532 = vmatpush.bf16.msrb.mxu0 %v1078_v37  ;;  %v1091_v37 = vld [vmem:[%s1428_s5 + $0x18] sm:$0xff] }
  0x27   :  { %545 = vmatpush.bf16.msrb.mxu1 %v1086_v38  ;;  %v1099_v38 = vld [vmem:[%s1428_s5 + $0x58] sm:$0xff] }
  0x28   :  { %523 = vmatpush.bf16.msra.mxu3 %v1066_v49  ;;  %712 = vmatpush.bf16.msrb.mxu2 %v1094_v26 }
  0x2a   :  { %533 = vmatpush.bf16.msrb.mxu0 %v1077_v40 }
  0x2b   :  { %546 = vmatpush.bf16.msrb.mxu1 %v1085_v41 }
  0x2c   :  { %524 = vmatpush.bf16.msra.mxu3 %v1065_v52  ;;  %713 = vmatpush.bf16.msrb.mxu2 %v1093_v28  ;;  %v1088_v52 = vld [vmem:[%s1428_s5] sm:$0xff] }
  0x2e   :  { %534 = vmatpush.bf16.msrb.mxu0 %v1076_v43  ;;  %v1090_v43 = vld [vmem:[%s1428_s5 + $0x10] sm:$0xff] }
  0x2f   :  { %547 = vmatpush.bf16.msrb.mxu1 %v1084_v44  ;;  %v1098_v44 = vld [vmem:[%s1428_s5 + $0x50] sm:$0xff] }
  0x30   :  { %525 = vmatpush.bf16.msra.mxu3 %v1064_v55  ;;  %714 = vmatpush.bf16.msrb.mxu2 %v1092_v33 }
  0x32   :  { %535 = vmatpush.bf16.msrb.mxu0 %v1075_v47  ;;  %v1089_v47 = vld [vmem:[%s1428_s5 + $0x8] sm:$0xff] }
  0x33   :  { %548 = vmatpush.bf16.msrb.mxu1 %v1083_v48  ;;  %v1097_v48 = vld [vmem:[%s1428_s5 + $0x48] sm:$0xff] }
  0x34   :  { %724 = vmatpush.bf16.msrb.mxu3 %v1103_v25  ;;  %715 = vmatpush.bf16.msrb.mxu2 %v1091_v37 }
  0x36   :  { %536 = vmatpush.bf16.msrb.mxu0 %v1074_v50 }
  0x37   :  { %549 = vmatpush.bf16.msrb.mxu1 %v1082_v51 }
  0x38   :  { %725 = vmatpush.bf16.msrb.mxu3 %v1102_v27  ;;  %716 = vmatpush.bf16.msrb.mxu2 %v1090_v43 }
  0x3a   :  { %537 = vmatpush.bf16.msrb.mxu0 %v1073_v53  ;;  %v1096_v53 = vld [vmem:[%s1428_s5 + $0x40] sm:$0xff] }
  0x3b   :  { %550 = vmatpush.bf16.msrb.mxu1 %v1081_v54  ;;  %v740_v54 = vld [vmem:[%s1430_s7] sm:$0x3]  ;;  %s1148_s7 = smov 96  }
  0x3c   :  { %726 = vmatpush.bf16.msrb.mxu3 %v1101_v29  ;;  %717 = vmatpush.bf16.msrb.mxu2 %v1089_v47 }
  0x3e   :  { %538 = vmatpush.bf16.msrb.mxu0 %v1072_v56 }
  0x3f   :  { %551 = vmatpush.bf16.msrb.mxu1 %v1080_v57 }
  0x40   :  { %727 = vmatpush.bf16.msrb.mxu3 %v1100_v34  ;;  %718 = vmatpush.bf16.msrb.mxu2 %v1088_v52 }
  0x44   :  { %728 = vmatpush.bf16.msrb.mxu3 %v1099_v38 }
  0x48   :  { %729 = vmatpush.bf16.msrb.mxu3 %v1098_v44 }
  0x4c   :  { %730 = vmatpush.bf16.msrb.mxu3 %v1097_v48 }
  0x50   :  { %731 = vmatpush.bf16.msrb.mxu3 %v1096_v53 }
  0x9e   :  { %v255_v59 = vpop.f32.mrf.mxu0 }
  0x9f   :  { %v256_v60 = vadd.f32 %v1114_v58, %v255_v59  ;;  %v269_v61 = vpop.f32.mrf.mxu1 }
  0xa1   :  { %v270_v62 = vadd.f32 %v269_v61, %v256_v60 }
  0xa6   :  { %v283_v63 = vpop.f32.mrf.mxu2  ;;  %v257_v1 = vpop.f32.mrf.mxu0 }
  0xa7   :  { %v284_v0 = vadd.f32 %v283_v63, %v270_v62  ;;  %v258_v3 = vadd.f32 %v1114_v58, %v257_v1  ;;  %v271_v4 = vpop.f32.mrf.mxu1 }
  0xa9   :  { %v288_v2 = vmax.f32 %v284_v0, 0.0  ;;  %v272_v5 = vadd.f32 %v271_v4, %v258_v3  ;;  %v1116_v0 = vld [vmem:[%s1429_s6] ss:$0 sm:$0xff]  ;;  %s760_s6 = sshll.u32 %s1431_s8, 4  ;;  %s761_s6 = int_to_ptr.hbm [resolvable:$true] %s760_s6 }
  0xab   :  { %291 = vst [vmem:[#allocation2 + $0x8] sm:$0xff] %v288_v2 }
  0xae   :  { %v285_v6 = vpop.f32.mrf.mxu2 }
  0xaf   :  { %v286_v7 = vadd.f32 %v285_v6, %v272_v5 }
  0xb1   :  { %v289_v8 = vmax.f32 %v286_v7, 0.0 }
  0xb2   :  { %v295_v9 = vld [vmem:[#allocation2 + $0x7] ss:$2 sm:$0xf]  ;;  %v297_v15 = vld [vmem:[#allocation2 + $0x8] ss:$2 sm:$0xf] }
  0xb3   :  { %293 = vst [vmem:[#allocation2 + $0x18] sm:$0xff] %v289_v8  ;;  %v299_v19 = vld [vmem:[#allocation2 + $0x9] ss:$2 sm:$0xf] }
  0xba   :  { %v301_v10 = vld [vmem:[#allocation2 + $0x17] ss:$2 sm:$0xf]  ;;  %v303_v11 = vld [vmem:[#allocation2 + $0x18] ss:$2 sm:$0xf] }
  0xbb   :  { %v309_v12 = vrot.slane %v301_v10, 4  ;;  %v310_v13 = vrot.slane %v303_v11, 4  ;;  %v305_v14 = vld [vmem:[#allocation2 + $0x19] ss:$2 sm:$0xf] }
  0xbc   :  { %v311_v16 = vrot.slane %v305_v14, 4 }
  0xbd   :  { %v316_v17 = vsel %vm315_vm0, %v295_v9, %v309_v12  ;;  %v317_v18 = vsel %vm315_vm0, %v297_v15, %v310_v13 }
  0xbe   :  { %v319_v20 = vpack.c.bf16 %v316_v17, %v316_v17  ;;  %v320_v21 = vpack.c.bf16 %v317_v18, %v317_v18  ;;  %v318_v22 = vsel %vm315_vm0, %v299_v19, %v311_v16 }
  0xbf   :  { %v321_v23 = vpack.c.bf16 %v318_v22, %v318_v22 }
  0xc0   :  { %526 = vmatmul.bf16.vlgmr.msra.gmra.mxu3 %v319_v20  ;;  %539 = vmatmul.bf16.vlgmr.msrb.gmra.mxu0 %v320_v21 }
  0xc1   :  { %552 = vmatmul.bf16.vlgmr.msrb.gmra.mxu1 %v321_v23 }
 0x13d   :  { %v540_v30 = vpop.f32.mrf.mxu0 }
 0x13e   :  { %v553_v31 = vpop.f32.mrf.mxu1 }
 0x143   :  { %v527_v35 = vpop.f32.mrf.mxu3 }
 0x144   :  { %v528_v36 = vadd.f32 %v1115_v32, %v527_v35 }
 0x145   :  { %v542_v39 = vpop.f32.mrf.mxu0 }
 0x146   :  { %v541_v40 = vadd.f32 %v540_v30, %v528_v36  ;;  %v555_v41 = vpop.f32.mrf.mxu1 }
 0x148   :  { %v554_v42 = vadd.f32 %v553_v31, %v541_v40 }
 0x14a   :  { %v557_v45 = vmax.f32 %v554_v42, 0.0 }
 0x14b   :  { %v529_v46 = vpop.f32.mrf.mxu3 }
 0x14c   :  { %559 = vst.msk [vmem:[#allocation3] sm:$0xff] %vm558_vm1, %v557_v45 }
 0x153   :  { %v562_v49 = vld [vmem:[#allocation3 + $0x1] ss:$4 sm:$0x3]  ;;  %v566_v50 = vld [vmem:[#allocation3 + $0x3] ss:$4 sm:$0x3] }
 0x154   :  { %v1109_v51 = vpack.i.bf16 %v566_v50, %v562_v49  ;;  %v560_v58 = vld [vmem:[#allocation3] ss:$4 sm:$0x3]  ;;  %v564_v59 = vld [vmem:[#allocation3 + $0x2] ss:$4 sm:$0x3] }
 0x156   :  { %1110 = vrot.lane.b32.xlu0 %v1109_v51, %s1146_s23 }
 0x15e   :  { %742 = vrot.lane.b32.xlu0 %v740_v54, %s1147_s29 }
 0x1c8   :  { %v1111_v55 = vpop.permute.xlu0 %1110 }
 0x1c9   :  { %v1113_v56 = vunpack.i.h.bf16 %v1111_v55  ;;  %v1112_v57 = vunpack.i.l.bf16 %v1111_v55 }
 0x1cb   :  { %v575_v60 = vsel %vm558_vm1, %v560_v58, %v1112_v57  ;;  %v576_v61 = vsel %vm558_vm1, %v564_v59, %v1113_v56 }
 0x1cc   :  { %v577_v62 = vpack.c.bf16 %v575_v60, %v575_v60  ;;  %v578_v63 = vpack.c.bf16 %v576_v61, %v576_v61 }
 0x1ce   :  { %719 = vmatmul.bf16.vlgmr.msrb.gmra.mxu2 %v577_v62  ;;  %732 = vmatmul.bf16.vlgmr.msrb.gmra.mxu3 %v578_v63 }
 0x1d0   :  { %v743_v9 = vpop.permute.xlu0 %742 }
 0x251   :  { %v720_v1 = vpop.f32.mrf.mxu2  ;;  %v733_v2 = vpop.f32.mrf.mxu3 }
 0x252   :  { %v721_v3 = vadd.f32 %v1116_v0, %v720_v1 }
 0x254   :  { %v734_v4 = vadd.f32 %v733_v2, %v721_v3 }
 0x256   :  { %v737_v5 = vmul.f32 0.5, %v734_v4 }
 0x258   :  { %v738_v6 = vmul.f32 1.442695, %v737_v5 }
 0x259   :  { %v722_v7 = vpop.f32.mrf.mxu2  ;;  %v735_v8 = vpop.f32.mrf.mxu3 }
 0x25a   :  { %1117 = vpow2.f32 %v738_v6 }
 0x260   :  { %v1118_v10 = vpop.eup %1117 }
 0x261   :  { %v745_v11 = vmul.f32 %v1118_v10, %v743_v9 }
 0x263   :  { %747 = vrot.lane.b32.xlu1 %v745_v11, %s1148_s7 }
 0x2d5   :  { %v748_v12 = vpop.permute.xlu1 %747 }
 0x2d6   :  { %v750_v13 = vadd.f32 %v748_v12, %v734_v4 }
 0x2d8   :  { %752 = vst.msk [vmem:[#allocation4] sm:$0x3] %vm751_vm2, %v750_v13 }
 0x2d9   :  { %763 = dma.vmem_to_hbm [thread:$0]  %s759_s10, 32, %s761_s6, [#allocation5]  }
 0x2da   :  { %1143 = dma.done.wait [#allocation5], 32  }
 0x2db   :  { %1144 = vsyncadd [#allocation5], 4294967264 }
 0x2dc   :  { %768 = vsyncpa [#allocation5], 1 }

</bundles_post_ra>
